<compile_context>
chip_gen: v7x
topology: tpu7x:2x2x1
jax: 0.10.0
libtpu: 0.0.40
codegen_flags: <defaults>
</compile_context>

<pallas_src>
import jax
import jax.numpy as jnp
from jax.experimental import pallas as pl
from jax.experimental.pallas import tpu as pltpu


def _round_up(x: int, m: int) -> int:
    return ((x + m - 1) // m) * m


# Per-operand byte budget below which we use the single-block (no-pad) fast path.
_FAST_PATH_BYTES = 2 * 1024 * 1024


def _pick_tile(dim: int, unit: int, cap: int) -> int:
    """Smallest-padding tile size: full (rounded) dim if <= cap, else the
    power-of-two-descending candidate <= cap that minimizes padding."""
    padded = _round_up(dim, unit)
    if padded <= cap:
        return padded
    best_t, best_pad = None, None
    t = cap
    while t >= unit:
        pad = _round_up(dim, t)
        if best_pad is None or pad < best_pad:
            best_t, best_pad = t, pad
        t //= 2
    return best_t


# ----------------------------------------------------------------------------- kernels


def _linear_small_kernel(x_ref, w_ref, o_ref):
    # Whole problem in one block: y = x @ W.T (contract last dims, no transpose).
    o_ref[...] = jax.lax.dot_general(
        x_ref[...],
        w_ref[...],
        dimension_numbers=(((1,), (1,)), ((), ())),
        preferred_element_type=jnp.float32,
    ).astype(o_ref.dtype)


def _linear_tiled_kernel_f32(x_ref, w_ref, o_ref):
    # Output tile is resident across the K axis (out index_map ignores k), so
    # accumulate directly into o_ref: k==0 writes, k>0 adds.  No scratch.
    part = jax.lax.dot_general(
        x_ref[...],
        w_ref[...],
        dimension_numbers=(((1,), (1,)), ((), ())),
        preferred_element_type=jnp.float32,
    )

    @pl.when(pl.program_id(2) == 0)
    def _init():
        o_ref[...] = part

    @pl.when(pl.program_id(2) != 0)
    def _acc():
        o_ref[...] += part


def _linear_tiled_kernel_acc(x_ref, w_ref, o_ref, acc_ref):
    # Low-precision output variant: keep the f32 accumulator so K partials are
    # not rounded through a narrow output dtype.
    @pl.when(pl.program_id(2) == 0)
    def _init():
        acc_ref[...] = jnp.zeros_like(acc_ref)

    acc_ref[...] += jax.lax.dot_general(
        x_ref[...],
        w_ref[...],
        dimension_numbers=(((1,), (1,)), ((), ())),
        preferred_element_type=jnp.float32,
    )

    @pl.when(pl.program_id(2) == pl.num_programs(2) - 1)
    def _store():
        o_ref[...] = acc_ref[...].astype(o_ref.dtype)


# ----------------------------------------------------------------------------- wrappers


def _small_call(x, w):
    batch, in_f = x.shape
    out_f = w.shape[0]
    return pl.pallas_call(
        _linear_small_kernel,
        out_shape=jax.ShapeDtypeStruct((batch, out_f), x.dtype),
        grid=(1,),
        in_specs=[
            pl.BlockSpec((batch, in_f), lambda i: (0, 0)),
            pl.BlockSpec((out_f, in_f), lambda i: (0, 0)),
        ],
        out_specs=pl.BlockSpec((batch, out_f), lambda i: (0, 0)),
    )(x, w)


def _tiled_call(x, w_padded, out_features, tn, tk, n_pad, k_pad):
    batch, in_f = x.shape

    tm = _pick_tile(batch, 8, 512)
    m_pad = _round_up(batch, tm)

    # Only x is padded per call (zero-padding the contraction dim is exact);
    # W was padded once when the ODE function was built.
    if (m_pad, k_pad) != (batch, in_f):
        x_p = jnp.pad(x, ((0, m_pad - batch), (0, k_pad - in_f)))
    else:
        x_p = x

    # Megacore (v7x): if the batch axis has a single tile, try to give the
    # out-features ("parallel") axis at least 2 iterations.
    if m_pad // tm == 1 and n_pad // tn < 2 and tn % 256 == 0:
        tn = tn // 2

    grid = (m_pad // tm, n_pad // tn, k_pad // tk)

    direct = x.dtype == jnp.float32
    kernel = _linear_tiled_kernel_f32 if direct else _linear_tiled_kernel_acc
    scratch = [] if direct else [pltpu.VMEM((tm, tn), jnp.float32)]

    y_p = pl.pallas_call(
        kernel,
        out_shape=jax.ShapeDtypeStruct((m_pad, n_pad), x.dtype),
        grid=grid,
        in_specs=[
            # x tile: rows follow batch axis i, cols follow K axis k.
            pl.BlockSpec((tm, tk), lambda i, j, k: (i, k)),
            # W tile in native [out, in] layout: (out tile j, K tile k); constant
            # in i, so for single-tile W it stays VMEM-resident after one DMA.
            pl.BlockSpec((tn, tk), lambda i, j, k: (j, k)),
        ],
        out_specs=pl.BlockSpec((tm, tn), lambda i, j, k: (i, j)),
        scratch_shapes=scratch,
        compiler_params=pltpu.CompilerParams(
            dimension_semantics=("parallel", "parallel", "arbitrary"),
        ),
    )(x_p, w_padded)

    return y_p[:batch, :out_features]


def make_linear_ode_func(w):
    """Build the Pallas equivalent of LinearODEFunc with weight `w` ([out, in]).

    Weight padding/layout happens ONCE here (W is time-independent and reused
    for every RHS evaluation of the ODE solve).  Returns f(t, x) -> x @ w.T.
    """
    out_f, in_f = w.shape
    tn = _pick_tile(out_f, 128, 512)
    tk = _pick_tile(in_f, 128, 1024)
    n_pad = _round_up(out_f, tn)
    k_pad = _round_up(in_f, tk)
    if (n_pad, k_pad) != (out_f, in_f):
        w_padded = jnp.pad(w, ((0, n_pad - out_f), (0, k_pad - in_f)))
    else:
        w_padded = w
    w_bytes = out_f * in_f * w.dtype.itemsize

    def ode_func(t, x):
        del t  # time-independent system; never enters the kernel.
        batch, k = x.shape
        assert k == in_f, "x feature dim must match weight in_features"
        itemsize = x.dtype.itemsize
        x_bytes = batch * in_f * itemsize
        o_bytes = batch * out_f * itemsize
        if max(x_bytes, w_bytes, o_bytes) <= _FAST_PATH_BYTES:
            return _small_call(x, w)           # no pad, single block, one MXU pass
        return _tiled_call(x, w_padded, out_f, tn, tk, n_pad, k_pad)

    return ode_func


def linear_ode_func(t, x, w):
    """One-shot convenience wrapper mirroring LinearODEFunc.forward(t, x)."""
    return make_linear_ode_func(w)(t, x)


if __name__ == "__main__":
    key = jax.random.PRNGKey(0)
    k_x, k_w, k_x2, k_w2 = jax.random.split(key, 4)
    t = jnp.float32(0.0)

    # --- Case 1: small shapes implied by the module (hidden=32) -> fast path.
    batch, in_features, out_features = 8, 32, 32
    x = jax.random.normal(k_x, (batch, in_features), dtype=jnp.float32)
    bound = 1.0 / jnp.sqrt(jnp.float32(in_features))  # mimic nn.Linear init
    w = jax.random.uniform(
        k_w, (out_features, in_features), dtype=jnp.float32,
        minval=-bound, maxval=bound,
    )

    ode_func = make_linear_ode_func(w)          # weight prep hoisted out of hot loop
    y = jax.block_until_ready(ode_func(t, x))
    assert y.shape == (batch, out_features)
    assert jnp.allclose(y, x @ w.T, atol=1e-5, rtol=1e-5)

    # --- Case 2: larger problem to exercise the tiled / K-accumulating path.
    b2, i2, o2 = 64, 1280, 768
    x2 = jax.random.normal(k_x2, (b2, i2), dtype=jnp.float32)
    w2 = jax.random.normal(k_w2, (o2, i2), dtype=jnp.float32) * 0.02
    y2 = jax.block_until_ready(make_linear_ode_func(w2)(t, x2))
    y2_ref = jax.lax.dot_general(
        x2, w2, dimension_numbers=(((1,), (1,)), ((), ())),
        precision=jax.lax.Precision.HIGHEST,
    )
    assert y2.shape == (b2, o2)
    assert jnp.allclose(y2, y2_ref, atol=1e-2, rtol=1e-2)

    print("KERNEL_OK")
</pallas_src>

<mosaic_0001>
module attributes {stable_mosaic.version = 11 : i64} {
  func.func @_linear_small_kernel(%arg0: i32, %arg1: memref<8x32xf32, #tpu.memory_space<vmem>>, %arg2: memref<32x32xf32, #tpu.memory_space<vmem>>, %arg3: memref<8x32xf32, #tpu.memory_space<vmem>>) attributes {dimension_semantics = [#tpu.dimension_semantics<arbitrary>], iteration_bounds = array<i64: 1>, scalar_prefetch = 0 : i64, scratch_operands = 0 : i64, tpu.core_type = #tpu.core_type<tc>, window_params = [{pipeline_mode = #tpu.pipeline_mode<synchronous>, transform_indices = @transform_0, window_bounds = array<i64: 8, 32>}, {pipeline_mode = #tpu.pipeline_mode<synchronous>, transform_indices = @transform_1, window_bounds = array<i64: 32, 32>}, {pipeline_mode = #tpu.pipeline_mode<synchronous>, transform_indices = @transform_2, window_bounds = array<i64: 8, 32>}]} {
    %c0 = arith.constant 0 : index
    %c0_0 = arith.constant 0 : index
    %0 = vector.load %arg1[%c0, %c0_0] : memref<8x32xf32, #tpu.memory_space<vmem>>, vector<8x32xf32>
    %c0_1 = arith.constant 0 : index
    %c0_2 = arith.constant 0 : index
    %1 = vector.load %arg2[%c0_1, %c0_2] : memref<32x32xf32, #tpu.memory_space<vmem>>, vector<32x32xf32>
    %cst = arith.constant dense<0.000000e+00> : vector<8x32xf32>
    %2 = tpu.matmul %0, %1, %cst {dimension_numbers = #tpu.dot_dimension_numbers<[1], [1], [0], [0], [0, 0, 1, 0], [], []>} : vector<8x32xf32>, vector<32x32xf32>, vector<8x32xf32> -> vector<8x32xf32>
    %c0_3 = arith.constant 0 : index
    %c0_4 = arith.constant 0 : index
    %3 = vector.load %arg3[%c0_3, %c0_4] : memref<8x32xf32, #tpu.memory_space<vmem>>, vector<8x32xf32>
    tpu.vector_store %arg3[%c0_3, %c0_4], %2 {strides = array<i32>} : memref<8x32xf32, #tpu.memory_space<vmem>>, vector<8x32xf32>,
    return
  }
  func.func @transform_0(%arg0: i32) -> (i32, i32) {
    %c0_i32 = arith.constant 0 : i32
    %c0_i32_0 = arith.constant 0 : i32
    %c0_i32_1 = arith.constant 0 : i32
    return %c0_i32, %c0_i32_0 : i32, i32
  }
  func.func @transform_1(%arg0: i32) -> (i32, i32) {
    %c0_i32 = arith.constant 0 : i32
    %c0_i32_0 = arith.constant 0 : i32
    %c0_i32_1 = arith.constant 0 : i32
    return %c0_i32, %c0_i32_0 : i32, i32
  }
  func.func @transform_2(%arg0: i32) -> (i32, i32) {
    %c0_i32 = arith.constant 0 : i32
    %c0_i32_0 = arith.constant 0 : i32
    %c0_i32_1 = arith.constant 0 : i32
    return %c0_i32, %c0_i32_0 : i32, i32
  }
}

</mosaic_0001>

<bundles_post_ra>
// kernel: tpu_custom_call.1
= control target key start
LH: loop header
LB: loop body
LE: loop exit
PB: predicated region body
PF: predicated region fallthrough
CT: control target
= control target key end

     0   :  { %7 = vsyncpa [#allocation3], 0  ;;  %s325_s0 = inlined_call_operand.hbm [shape: f32[8,32], index: 0, kind: input, shape index: {}]   ;;  %s326_s1 = inlined_call_operand.hbm [shape: f32[32,32], index: 1, kind: input, shape index: {}]   ;;  %s327_s2 = inlined_call_operand.hbm [shape: f32[8,32], index: 2, kind: output, shape index: {}]  }
   0x1   :  { %8 = vsyncpa [#allocation6], 0 }
   0x2   :  { %9 = vsyncpa [#allocation4], 0  ;;  %s255_s9 = smov [#allocation2]   ;;  %s256_s11 = smov [#allocation5]  }
   0x3   :  { %s16_s10 = sshll.u32 %s255_s9, 4  ;;  %s25_s12 = sshll.u32 %s256_s11, 4  ;;  %s17_s10 = int_to_ptr.vmem [resolvable:$true] %s16_s10  ;;  %s278_s12 = int_to_ptr.vmem [resolvable:$true] %s25_s12 }
   0x4   :  { %s183_s15 = scalar_lea.hbm %s325_s0, 128 }
   0x5   :  { %p184_p0 = scmp.ne.s32.totalorder %s325_s0, %s183_s15  ;;  %p187_p1 = scmp.lt.u32.totalorder %s183_s15, %s325_s0 }
   0x7   :  { %p189_p2 = pnand %p187_p1, %p184_p0 }
   0x9   :  { %192 = shalt.err (!%p189_p2)
}
   0xa   :  { %s193_s20 = scalar_lea.vmem %s17_s10, 128  ;;  %p198_p4 = scmp.lt.s32.totalorder %s17_s10, %s17_s10 }
   0xb   :  { %p194_p3 = scmp.ne.s32.totalorder %s17_s10, %s193_s20  ;;  %p199_p5 = scmp.lt.s32.totalorder %s193_s20, %s193_s20 }
   0xd   :  { %p200_p6 = por %p199_p5, %p198_p4 }
   0xf   :  { %p201_p7 = pnand %p200_p6, %p194_p3 }
  0x11   :  { %204 = shalt.err (!%p201_p7)
}
  0x12   :  { %19 = dma.hbm_to_vmem [thread:$0]  %s325_s0, 128, %s17_s10, [#allocation3]  }
  0x13   :  { %s205_s25 = scalar_lea.hbm %s326_s1, 512 }
  0x14   :  { %p206_p8 = scmp.ne.s32.totalorder %s326_s1, %s205_s25  ;;  %p209_p9 = scmp.lt.u32.totalorder %s205_s25, %s326_s1 }
  0x16   :  { %p211_p10 = pnand %p209_p9, %p206_p8 }
  0x18   :  { %214 = shalt.err (!%p211_p10)
}
  0x19   :  { %s215_s30 = scalar_lea.vmem %s278_s12, 512  ;;  %p220_p12 = scmp.lt.s32.totalorder %s278_s12, %s278_s12 }
  0x1a   :  { %p216_p11 = scmp.ne.s32.totalorder %s278_s12, %s215_s30  ;;  %p221_p13 = scmp.lt.s32.totalorder %s215_s30, %s215_s30 }
  0x1c   :  { %p222_p0 = por %p221_p13, %p220_p12 }
  0x1e   :  { %p223_p1 = pnand %p222_p0, %p216_p11 }
  0x20   :  { %226 = shalt.err (!%p223_p1)
}
  0x21   :  { %s257_s0 = smov 128   ;;  %s258_s3 = smov 8  }
  0x22   :  { %31 = dma.hbm_to_vmem [thread:$0]  %s326_s1, 512, %s278_s12, [#allocation6], %s257_s0, %s257_s0, %s258_s3  }
  0x23   :  { %249 = dma.done.wait [#allocation3], 128  }
  0x24   :  { %250 = vsyncadd [#allocation3], 4294967168 }
  0x25   :  { %251 = dma.done.wait [#allocation6], 512  }
  0x26   :  { %252 = vsyncadd [#allocation6], 4294966784  ;;  %v259_v0 = vmov 0.0|0.0   ;;  %vm260_vm0 = vmmov 0   ;;  %v261_v1 = vmov 0.0   ;;  %vm43_vm1 = vcmask 261120  }
  0x27   :  { %167 = vmatprep.subr.bf16.mxu0 %v259_v0  ;;  %164 = vmatprep.mubr.msk.f32.mxu0 %vm260_vm0, %v261_v1  ;;  %v39_v2 = vld [vmem:[#allocation5] sm:$0xff]  ;;  %v40_v3 = vld [vmem:[#allocation5 + $0x8] sm:$0xff]  ;;  %vm169_vm2 = vmpackc.low %vm43_vm1, %vm43_vm1  ;;  %s262_s1 = smov [#allocation7]  }
  0x28   :  { %v168_v4 = vpack.c.bf16 %v40_v3, %v39_v2  ;;  %v41_v5 = vld [vmem:[#allocation5 + $0x10] sm:$0xff]  ;;  %v42_v6 = vld [vmem:[#allocation5 + $0x18] sm:$0xff]  ;;  %s136_s6 = sshll.u32 %s262_s1, 4  ;;  %s137_s6 = int_to_ptr.vmem [resolvable:$true] %s136_s6 }
  0x29   :  { %v172_v7 = vpack.c.bf16 %v42_v6, %v41_v5  ;;  %v38_v8 = vld [vmem:[#allocation2] sm:$0xff]  ;;  %s227_s7 = scalar_lea.vmem %s137_s6, 128  ;;  %p232_p3 = scmp.lt.s32.totalorder %s137_s6, %s137_s6 }
  0x2a   :  { %170 = vmatpush3.bf16.xpose.msk.msra.mxu0 %vm169_vm2, %v168_v4  ;;  %p228_p2 = scmp.ne.s32.totalorder %s137_s6, %s227_s7  ;;  %p233_p4 = scmp.lt.s32.totalorder %s227_s7, %s227_s7 }
  0x2b   :  { %171 = vmatprep.subr.bf16.mxu0 %v259_v0 }
  0x2c   :  { %p234_p5 = por %p233_p4, %p232_p3 }
  0x2e   :  { %p235_p6 = pnand %p234_p5, %p228_p2 }
  0x32   :  { %174 = vmatpush3.bf16.xpose.msk.msra.mxu0 %vm169_vm2, %v172_v7 }
  0x39   :  { %165 = vmatmul.mubr.msk.f32.vlgmr.msra.gmra.mrb[0].mxu0 %vm43_vm1, %v38_v8 }
 0x10c   :  { %v125_v9 = vpop.f32.mrb[0].mxu0 }
 0x10d   :  { %129 = vst.msk [vmem:[#allocation7] sm:$0xff] %vm43_vm1, %v125_v9  ;;  %v166_v10 = vpop.f32.mrb[1].mxu0 }
 0x10e   :  { %238 = shalt.err (!%p235_p6)
}
 0x10f   :  { %s239_s10 = scalar_lea.hbm %s327_s2, 128 }
 0x110   :  { %p240_p7 = scmp.ne.s32.totalorder %s327_s2, %s239_s10  ;;  %p243_p8 = scmp.lt.u32.totalorder %s239_s10, %s327_s2 }
 0x112   :  { %p245_p9 = pnand %p243_p8, %p240_p7 }
 0x114   :  { %248 = shalt.err (!%p245_p9)
}
 0x115   :  { %139 = dma.vmem_to_hbm [thread:$0]  %s137_s6, 128, %s327_s2, [#allocation4]  }
 0x116   :  { %253 = dma.done.wait [#allocation4], 128  }
 0x117   :  { %254 = vsyncadd [#allocation4], 4294967168 }
 0x118   :  { %143 = vsyncpa [#allocation3], 1 }
 0x119   :  { %144 = vsyncpa [#allocation6], 1 }
 0x11a   :  { %145 = vsyncpa [#allocation4], 1 }

</bundles_post_ra>
